<compile_context>
chip_gen: v7x
topology: tpu7x:2x2x1
jax: 0.10.0
libtpu: 0.0.40
codegen_flags: <defaults>
</compile_context>

<pallas_src>
import functools

import jax
import jax.numpy as jnp
import numpy as np
from jax.experimental import pallas as pl
from jax.experimental.pallas import tpu as pltpu

_ROOM_PARAM_PRED_LAYERS = [(384, 3, 1, 1), (384, 3, 1, 1), (384, 5, 3, 0), (384, 3, 1, 1)]
_TASKS = ("Th", "Tt", "volume", "dist_src")
_LANES = 128


def _vpu_supports_bf16() -> bool:
    """bf16 VALU exists on v6e/v7x but not on v2-v5; default to f32 math if unsure."""
    try:
        kind = jax.devices()[0].device_kind.lower()
    except Exception:
        return False
    return not any(f"v{v}" in kind for v in (2, 3, 4, 5))


# ----------------------------- Pallas kernel -------------------------------------------
def _partial_sums_kernel(th_ref, tt_ref, vol_ref, ds_ref, len_ref, gt_ref, out_ref,
                         *, compute_dtype):
    """One pass over a (B, tile_r, 128) time tile of each prediction.

    Accumulates, per (sample, task), the masked SmoothL1 sum and the masked sum of
    (hat - gt) into the resident output block out_ref = (1, 2, B, 4):
      row 0 = SmoothL1 sums, row 1 = masked diff sums.
    """
    r = pl.program_id(1)

    @pl.when(r == 0)
    def _init():
        out_ref[...] = jnp.zeros_like(out_ref)

    B, tile_r, lanes = th_ref.shape
    # Absolute frame index of every element in this tile — the validity mask is
    # rebuilt in-kernel, so it never touches HBM.  Zero-padded tail frames have
    # frame >= T >= out_len and are therefore masked out automatically.
    row_block = pl.program_id(0) * pl.num_programs(1) + r
    frame = (row_block * (tile_r * lanes)
             + jax.lax.broadcasted_iota(jnp.int32, (1, tile_r, lanes), 1) * lanes
             + jax.lax.broadcasted_iota(jnp.int32, (1, tile_r, lanes), 2))
    valid = frame < len_ref[...][:, :, None]               # (B, tile_r, lanes) bool
    gt = gt_ref[...].astype(compute_dtype)                 # (B, 4)

    sl1_cols, dm_cols = [], []
    for i, ref in enumerate((th_ref, tt_ref, vol_ref, ds_ref)):
        h = ref[...].astype(compute_dtype)                 # native dtype from HBM
        # Single masked select per task: SmoothL1(0) == 0, so masking the diff is
        # enough for both statistics.
        dm = jnp.where(valid, h - gt[:, i].reshape(B, 1, 1), 0.0)
        a = jnp.abs(dm)
        sl1 = jnp.where(a < 1.0, 0.5 * dm * dm, a - 0.5)   # SmoothL1, beta = 1
        # Elementwise chain stays in compute_dtype (bf16 on v6e/v7x when inputs are
        # bf16); reductions are done in f32 to preserve accuracy.
        sl1_cols.append(
            jnp.sum(jnp.sum(sl1.astype(jnp.float32), axis=2), axis=1)[:, None])
        dm_cols.append(
            jnp.sum(jnp.sum(dm.astype(jnp.float32), axis=2), axis=1)[:, None])

    upd = jnp.stack([jnp.concatenate(sl1_cols, axis=1),        # (B, 4)
                     jnp.concatenate(dm_cols, axis=1)], axis=0)[None]   # (1, 2, B, 4)
    out_ref[...] += upd


def _plan(T: int, n_par_pref: int = 2):
    """Time tiling: row-blocks of 128 frames, 8 or 16 rows (1-2K frames) per grid step,
    plus an optional 2-way 'parallel' split of the row-blocks (2nd TC on v7x;
    harmless on single-TC chips)."""
    n_rows = pl.cdiv(T, _LANES)
    tile_r = 8 if n_rows < 64 else 16
    n_par = n_par_pref if n_rows >= 2 * tile_r else 1
    n_steps = pl.cdiv(n_rows, n_par * tile_r)
    rows_pad = n_par * n_steps * tile_r
    return tile_r, n_par, n_steps, rows_pad


def _run_partial_sums(hats, gt, out_len):
    B, T = hats[0].shape
    tile_r, n_par, n_steps, rows_pad = _plan(T)
    T_pad = rows_pad * _LANES

    # Free reshape when T is already aligned; otherwise one zero-pad copy.  Padded
    # frames are masked out in-kernel (frame >= out_len).
    def prep(h):
        if T_pad != T:
            h = jnp.pad(h, ((0, 0), (0, T_pad - T)))
        return h.reshape(B, rows_pad, _LANES)

    hats3 = [prep(h) for h in hats]

    in_dtype = jnp.result_type(*[h.dtype for h in hats])
    compute_dtype = (jnp.bfloat16
                     if in_dtype == jnp.bfloat16 and _vpu_supports_bf16()
                     else jnp.float32)

    pred_spec = pl.BlockSpec((B, tile_r, _LANES), lambda c, r: (0, c * n_steps + r, 0))
    resident = lambda shape: pl.BlockSpec(shape, lambda c, r: (0, 0))

    partials = pl.pallas_call(
        functools.partial(_partial_sums_kernel, compute_dtype=compute_dtype),
        out_shape=jax.ShapeDtypeStruct((n_par, 2, B, 4), jnp.float32),
        grid=(n_par, n_steps),
        in_specs=[pred_spec, pred_spec, pred_spec, pred_spec,
                  resident((B, 1)), resident((B, 4))],
        out_specs=pl.BlockSpec((1, 2, B, 4), lambda c, r: (c, 0, 0, 0)),
        compiler_params=pltpu.CompilerParams(
            dimension_semantics=("parallel", "arbitrary")),   # reduction axis last
    )(*hats3, out_len, gt)

    sums = jnp.sum(partials, axis=0)          # combine per-core partials (tiny)
    return sums[0], sums[1]                    # sl1_sum (B, 4), dm_sum (B, 4)


# ----------------------------- plain-JAX glue -------------------------------------------
def _conv_out_lengths(input_lengths):
    L = input_lengths.astype(jnp.float32)
    for _, k, s, p in _ROOM_PARAM_PRED_LAYERS:
        L = jnp.floor((L + 2 * p - (k - 1) - 1) / s + 1)
    return L.astype(jnp.int32)


class MultiTaskLoss:
    """JAX/Pallas port of the PyTorch MultiTaskLoss (no trainable parameters)."""

    def __init__(self, phase: str):
        assert phase in ("train", "val"), f"Invalid phase: {phase}"
        self.phase = phase

    def __call__(self, param_hat, param_groundtruth):
        hats = [param_hat[f"{n}_hat"] for n in _TASKS]
        padding_mask = param_hat["padding_mask"]
        assert all(h.shape == hats[0].shape for h in hats)
        B, T = hats[0].shape
        gt = jnp.stack([param_groundtruth[n] for n in _TASKS], axis=1).astype(jnp.float32)

        if padding_mask is None:
            out_len = jnp.full((B, 1), T, dtype=jnp.int32)
        else:
            # No host sync: a row without padding gets out_len == conv_out(T_in) == T,
            # which reproduces the reference "plain mean" branch.
            input_lengths = jnp.sum(1 - padding_mask.astype(jnp.int32), axis=-1)
            out_len = jnp.minimum(_conv_out_lengths(input_lengths), T)[:, None]

        sl1_sum, dm_sum = _run_partial_sums(hats, gt, out_len)     # (B, 4) each, f32

        # Tiny O(B*4) epilogue with exact division (no approx reciprocal, no count
        # clamping: fully padded rows yield NaN exactly like the PyTorch reference).
        cnt = out_len.astype(jnp.float32)                           # (B, 1)
        out = {}
        if self.phase == "train":
            train = jnp.sum(sl1_sum, axis=0) / jnp.sum(cnt)         # (4,)
            for i, n in enumerate(_TASKS):
                out[f"loss_{n}"] = train[i]
        else:
            mean_hat = dm_sum / cnt + gt                            # masked time-mean
            val = jnp.mean(jnp.abs(mean_hat - gt), axis=0)          # (4,)
            mh = mean_hat - jnp.mean(mean_hat, axis=0, keepdims=True)
            mg = gt - jnp.mean(gt, axis=0, keepdims=True)
            cov = jnp.sum(mh * mg, axis=0)
            corr = jnp.abs(cov / jnp.sqrt(jnp.sum(mh * mh, axis=0)
                                          * jnp.sum(mg * mg, axis=0)))
            corr = jnp.clip(corr, 0.0, 1.0)     # torchmetrics clamps to [-1, 1]
            for i, n in enumerate(_TASKS):
                out[f"loss_{n}"] = val[i]
                out[f"corr_{n}"] = corr[i]
        return out


# ----------------------------- demo / self-check ----------------------------------------
def _reference_losses(hats, gt, out_len_vec):
    """Pure-JAX reference of the padded branch (f32 math)."""
    B, T = hats[0].shape
    mask = (jnp.arange(T)[None, :] < out_len_vec[:, None]).astype(jnp.float32)
    ref = {}
    for i, n in enumerate(_TASKS):
        h = hats[i].astype(jnp.float32)
        g = gt[:, i]
        d = h - g[:, None]
        a = jnp.abs(d)
        sl1 = jnp.where(a < 1.0, 0.5 * d * d, a - 0.5)
        ref[f"train_{n}"] = jnp.sum(sl1 * mask) / jnp.sum(mask)
        mean_h = jnp.sum(h * mask, axis=1) / jnp.sum(mask, axis=1)
        ref[f"val_{n}"] = jnp.mean(jnp.abs(mean_h - g))
        mh = mean_h - mean_h.mean()
        mg = g - g.mean()
        ref[f"corr_{n}"] = jnp.abs(jnp.sum(mh * mg) /
                                   jnp.sqrt(jnp.sum(mh * mh) * jnp.sum(mg * mg)))
    return ref


if __name__ == "__main__":
    master_key = jax.random.PRNGKey(0)

    def make_case(key, B, T_in, T, row_lengths, dtype=jnp.float32):
        keys = jax.random.split(key, 8)
        lengths = jnp.asarray(row_lengths)[:, None]
        param_hat = {
            "Th_hat": jax.random.normal(keys[0], (B, T), jnp.float32).astype(dtype),
            "Tt_hat": jax.random.normal(keys[1], (B, T), jnp.float32).astype(dtype),
            "volume_hat": jax.random.normal(keys[2], (B, T), jnp.float32).astype(dtype),
            "dist_src_hat": jax.random.normal(keys[3], (B, T), jnp.float32).astype(dtype),
            "padding_mask": jnp.arange(T_in)[None, :] >= lengths,   # True = padded frame
        }
        param_gt = {n: jax.random.normal(k, (B,), jnp.float32)
                    for n, k in zip(_TASKS, keys[4:])}
        return param_hat, param_gt

    def check(param_hat, param_gt, rtol, atol, corr_atol):
        B, T = param_hat["Th_hat"].shape
        train_out = MultiTaskLoss("train")(param_hat, param_gt)
        val_out = MultiTaskLoss("val")(param_hat, param_gt)
        jax.block_until_ready((train_out, val_out))

        input_lengths = jnp.sum(1 - param_hat["padding_mask"].astype(jnp.int32), axis=-1)
        out_len = jnp.minimum(_conv_out_lengths(input_lengths), T)
        gt = jnp.stack([param_gt[n] for n in _TASKS], axis=1)
        hats = [param_hat[f"{n}_hat"] for n in _TASKS]
        ref = _reference_losses(hats, gt, out_len)
        for n in _TASKS:
            assert np.allclose(train_out[f"loss_{n}"], ref[f"train_{n}"],
                               rtol=rtol, atol=atol), f"train {n}"
            assert np.allclose(val_out[f"loss_{n}"], ref[f"val_{n}"],
                               rtol=rtol, atol=atol), f"val {n}"
            assert np.allclose(val_out[f"corr_{n}"], ref[f"corr_{n}"],
                               rtol=rtol, atol=corr_atol), f"corr {n}"

    k1, k2 = jax.random.split(master_key)

    # Case 1: small shapes (B=4, conv-output T=32 of a 100-frame input), ragged rows.
    hat1, gt1 = make_case(k1, B=4, T_in=100, T=32, row_lengths=[100, 70, 55, 100])
    check(hat1, gt1, rtol=2e-3, atol=1e-5, corr_atol=5e-4)

    # Case 1b: no padding mask -> plain mean / plain time-mean branch.
    train_np = MultiTaskLoss("train")({**hat1, "padding_mask": None}, gt1)
    jax.block_until_ready(train_np)
    for n in _TASKS:
        h = hat1[f"{n}_hat"]
        d = h - gt1[n][:, None]
        a = jnp.abs(d)
        ref = jnp.mean(jnp.where(a < 1.0, 0.5 * d * d, a - 0.5))
        assert np.allclose(train_np[f"loss_{n}"], ref, rtol=2e-3, atol=1e-5), n

    # Case 2: larger T (2200) -> multi-step grid, 2-way parallel split, ragged tail tile.
    hat2, gt2 = make_case(k2, B=4, T_in=6602, T=2200,
                          row_lengths=[6602, 4000, 2500, 6602])
    check(hat2, gt2, rtol=2e-3, atol=1e-5, corr_atol=5e-4)

    # Case 2 in bf16: exercises the bf16-VALU path on v6e/v7x (stays f32 on v5e);
    # loose tolerances account for bf16 elementwise rounding before the f32 sums.
    hat2b = {k: (v.astype(jnp.bfloat16) if k != "padding_mask" else v)
             for k, v in hat2.items()}
    check(hat2b, gt2, rtol=1e-1, atol=5e-2, corr_atol=1e-1)

    print("KERNEL_OK")
</pallas_src>

<mosaic_0001>
module attributes {stable_mosaic.version = 11 : i64} {
  func.func @_partial_sums_kernel(%arg0: i32, %arg1: i32, %arg2: memref<4x8x128xf32, #tpu.memory_space<vmem>>, %arg3: memref<4x8x128xf32, #tpu.memory_space<vmem>>, %arg4: memref<4x8x128xf32, #tpu.memory_space<vmem>>, %arg5: memref<4x8x128xf32, #tpu.memory_space<vmem>>, %arg6: memref<4x1xi32, #tpu.memory_space<vmem>>, %arg7: memref<4x4xf32, #tpu.memory_space<vmem>>, %arg8: memref<1x2x4x4xf32, #tpu.memory_space<vmem>>) attributes {dimension_semantics = [#tpu.dimension_semantics<parallel>, #tpu.dimension_semantics<arbitrary>], iteration_bounds = array<i64: 1, 1>, scalar_prefetch = 0 : i64, scratch_operands = 0 : i64, tpu.core_type = #tpu.core_type<tc>, window_params = [{transform_indices = @transform_0, window_bounds = array<i64: 4, 8, 128>}, {transform_indices = @transform_1, window_bounds = array<i64: 4, 8, 128>}, {transform_indices = @transform_2, window_bounds = array<i64: 4, 8, 128>}, {transform_indices = @transform_3, window_bounds = array<i64: 4, 8, 128>}, {pipeline_mode = #tpu.pipeline_mode<synchronous>, transform_indices = @transform_4, window_bounds = array<i64: 4, 1>}, {pipeline_mode = #tpu.pipeline_mode<synchronous>, transform_indices = @transform_5, window_bounds = array<i64: 4, 4>}, {transform_indices = @transform_6, window_bounds = array<i64: 1, 2, 4, 4>}]} {
    %c0_i32 = arith.constant 0 : i32
    %0 = arith.cmpi eq, %arg1, %c0_i32 : i32
    %1 = arith.extui %0 : i1 to i32
    %c0_i32_0 = arith.constant 0 : i32
    %2 = arith.cmpi ne, %1, %c0_i32_0 : i32
    scf.if %2 {
      %cst_55 = arith.constant 0.000000e+00 : f32
      %120 = vector.broadcast %cst_55 : f32 to vector<1x2x4x4xf32>
      %c0_56 = arith.constant 0 : index
      %c0_57 = arith.constant 0 : index
      %c0_58 = arith.constant 0 : index
      %c0_59 = arith.constant 0 : index
      %121 = vector.load %arg8[%c0_56, %c0_57, %c0_58, %c0_59] : memref<1x2x4x4xf32, #tpu.memory_space<vmem>>, vector<1x2x4x4xf32>
      tpu.vector_store %arg8[%c0_56, %c0_57, %c0_58, %c0_59], %120 {strides = array<i32>} : memref<1x2x4x4xf32, #tpu.memory_space<vmem>>, vector<1x2x4x4xf32>,
    } else {
    }
    %c1_i32 = arith.constant 1 : i32
    %3 = arith.muli %arg0, %c1_i32 : i32
    %4 = arith.addi %3, %arg1 : i32
    %c1024_i32 = arith.constant 1024 : i32
    %5 = arith.muli %4, %c1024_i32 : i32
    %6 = tpu.iota {dimensions = array<i32: 1>} : vector<1x8x128xi32>
    %c128_i32 = arith.constant 128 : i32
    %7 = vector.broadcast %c128_i32 : i32 to vector<1x8x128xi32>
    %8 = arith.muli %6, %7 : vector<1x8x128xi32>
    %9 = vector.broadcast %5 : i32 to vector<1x8x128xi32>
    %10 = arith.addi %9, %8 : vector<1x8x128xi32>
    %11 = tpu.iota {dimensions = array<i32: 2>} : vector<1x8x128xi32>
    %12 = arith.addi %10, %11 : vector<1x8x128xi32>
    %c0 = arith.constant 0 : index
    %c0_1 = arith.constant 0 : index
    %13 = vector.load %arg6[%c0, %c0_1] : memref<4x1xi32, #tpu.memory_space<vmem>>, vector<4x1xi32>
    %14 = vector.shape_cast %13 : vector<4x1xi32> to vector<4x1x1xi32>
    %15 = vector.broadcast %12 : vector<1x8x128xi32> to vector<4x8x128xi32>
    %16 = vector.broadcast %14 : vector<4x1x1xi32> to vector<4x8x128xi32>
    %17 = arith.cmpi slt, %15, %16 : vector<4x8x128xi32>
    %c0_2 = arith.constant 0 : index
    %c0_3 = arith.constant 0 : index
    %18 = vector.load %arg7[%c0_2, %c0_3] : memref<4x4xf32, #tpu.memory_space<vmem>>, vector<4x4xf32>
    %c0_4 = arith.constant 0 : index
    %c0_5 = arith.constant 0 : index
    %c0_6 = arith.constant 0 : index
    %19 = vector.load %arg2[%c0_4, %c0_5, %c0_6] : memref<4x8x128xf32, #tpu.memory_space<vmem>>, vector<4x8x128xf32>
    %20 = vector.extract_strided_slice %18 {offsets = [0, 0], sizes = [4, 1], strides = [1, 1]} : vector<4x4xf32> to vector<4x1xf32>
    %21 = vector.shape_cast %20 : vector<4x1xf32> to vector<4xf32>
    %22 = vector.shape_cast %21 : vector<4xf32> to vector<4x1x1xf32>
    %23 = vector.broadcast %22 : vector<4x1x1xf32> to vector<4x8x128xf32>
    %24 = arith.subf %19, %23 : vector<4x8x128xf32>
    %cst = arith.constant 0.000000e+00 : f32
    %25 = vector.broadcast %cst : f32 to vector<4x8x128xf32>
    %26 = arith.select %17, %24, %25 : vector<4x8x128xi1>, vector<4x8x128xf32>
    %27 = math.absf %26 : vector<4x8x128xf32>
    %cst_7 = arith.constant 1.000000e+00 : f32
    %28 = vector.broadcast %cst_7 : f32 to vector<4x8x128xf32>
    %29 = arith.cmpf olt, %27, %28 : vector<4x8x128xf32>
    %cst_8 = arith.constant 5.000000e-01 : f32
    %30 = vector.broadcast %cst_8 : f32 to vector<4x8x128xf32>
    %31 = arith.mulf %30, %26 : vector<4x8x128xf32>
    %32 = arith.mulf %31, %26 : vector<4x8x128xf32>
    %cst_9 = arith.constant 5.000000e-01 : f32
    %33 = vector.broadcast %cst_9 : f32 to vector<4x8x128xf32>
    %34 = arith.subf %27, %33 : vector<4x8x128xf32>
    %35 = arith.select %29, %32, %34 : vector<4x8x128xi1>, vector<4x8x128xf32>
    %cst_10 = arith.constant dense<0.000000e+00> : vector<4x8xf32>
    %36 = vector.multi_reduction <add>, %35, %cst_10 [2] : vector<4x8x128xf32> to vector<4x8xf32>
    %cst_11 = arith.constant dense<0.000000e+00> : vector<4xf32>
    %37 = vector.multi_reduction <add>, %36, %cst_11 [1] : vector<4x8xf32> to vector<4xf32>
    %38 = vector.shape_cast %37 : vector<4xf32> to vector<4x1xf32>
    %cst_12 = arith.constant dense<0.000000e+00> : vector<4x8xf32>
    %39 = vector.multi_reduction <add>, %26, %cst_12 [2] : vector<4x8x128xf32> to vector<4x8xf32>
    %cst_13 = arith.constant dense<0.000000e+00> : vector<4xf32>
    %40 = vector.multi_reduction <add>, %39, %cst_13 [1] : vector<4x8xf32> to vector<4xf32>
    %41 = vector.shape_cast %40 : vector<4xf32> to vector<4x1xf32>
    %c0_14 = arith.constant 0 : index
    %c0_15 = arith.constant 0 : index
    %c0_16 = arith.constant 0 : index
    %42 = vector.load %arg3[%c0_14, %c0_15, %c0_16] : memref<4x8x128xf32, #tpu.memory_space<vmem>>, vector<4x8x128xf32>
    %43 = vector.extract_strided_slice %18 {offsets = [0, 1], sizes = [4, 1], strides = [1, 1]} : vector<4x4xf32> to vector<4x1xf32>
    %44 = vector.shape_cast %43 : vector<4x1xf32> to vector<4xf32>
    %45 = vector.shape_cast %44 : vector<4xf32> to vector<4x1x1xf32>
    %46 = vector.broadcast %45 : vector<4x1x1xf32> to vector<4x8x128xf32>
    %47 = arith.subf %42, %46 : vector<4x8x128xf32>
    %cst_17 = arith.constant 0.000000e+00 : f32
    %48 = vector.broadcast %cst_17 : f32 to vector<4x8x128xf32>
    %49 = arith.select %17, %47, %48 : vector<4x8x128xi1>, vector<4x8x128xf32>
    %50 = math.absf %49 : vector<4x8x128xf32>
    %cst_18 = arith.constant 1.000000e+00 : f32
    %51 = vector.broadcast %cst_18 : f32 to vector<4x8x128xf32>
    %52 = arith.cmpf olt, %50, %51 : vector<4x8x128xf32>
    %cst_19 = arith.constant 5.000000e-01 : f32
    %53 = vector.broadcast %cst_19 : f32 to vector<4x8x128xf32>
    %54 = arith.mulf %53, %49 : vector<4x8x128xf32>
    %55 = arith.mulf %54, %49 : vector<4x8x128xf32>
    %cst_20 = arith.constant 5.000000e-01 : f32
    %56 = vector.broadcast %cst_20 : f32 to vector<4x8x128xf32>
    %57 = arith.subf %50, %56 : vector<4x8x128xf32>
    %58 = arith.select %52, %55, %57 : vector<4x8x128xi1>, vector<4x8x128xf32>
    %cst_21 = arith.constant dense<0.000000e+00> : vector<4x8xf32>
    %59 = vector.multi_reduction <add>, %58, %cst_21 [2] : vector<4x8x128xf32> to vector<4x8xf32>
    %cst_22 = arith.constant dense<0.000000e+00> : vector<4xf32>
    %60 = vector.multi_reduction <add>, %59, %cst_22 [1] : vector<4x8xf32> to vector<4xf32>
    %61 = vector.shape_cast %60 : vector<4xf32> to vector<4x1xf32>
    %cst_23 = arith.constant dense<0.000000e+00> : vector<4x8xf32>
    %62 = vector.multi_reduction <add>, %49, %cst_23 [2] : vector<4x8x128xf32> to vector<4x8xf32>
    %cst_24 = arith.constant dense<0.000000e+00> : vector<4xf32>
    %63 = vector.multi_reduction <add>, %62, %cst_24 [1] : vector<4x8xf32> to vector<4xf32>
    %64 = vector.shape_cast %63 : vector<4xf32> to vector<4x1xf32>
    %c0_25 = arith.constant 0 : index
    %c0_26 = arith.constant 0 : index
    %c0_27 = arith.constant 0 : index
    %65 = vector.load %arg4[%c0_25, %c0_26, %c0_27] : memref<4x8x128xf32, #tpu.memory_space<vmem>>, vector<4x8x128xf32>
    %66 = vector.extract_strided_slice %18 {offsets = [0, 2], sizes = [4, 1], strides = [1, 1]} : vector<4x4xf32> to vector<4x1xf32>
    %67 = vector.shape_cast %66 : vector<4x1xf32> to vector<4xf32>
    %68 = vector.shape_cast %67 : vector<4xf32> to vector<4x1x1xf32>
    %69 = vector.broadcast %68 : vector<4x1x1xf32> to vector<4x8x128xf32>
    %70 = arith.subf %65, %69 : vector<4x8x128xf32>
    %cst_28 = arith.constant 0.000000e+00 : f32
    %71 = vector.broadcast %cst_28 : f32 to vector<4x8x128xf32>
    %72 = arith.select %17, %70, %71 : vector<4x8x128xi1>, vector<4x8x128xf32>
    %73 = math.absf %72 : vector<4x8x128xf32>
    %cst_29 = arith.constant 1.000000e+00 : f32
    %74 = vector.broadcast %cst_29 : f32 to vector<4x8x128xf32>
    %75 = arith.cmpf olt, %73, %74 : vector<4x8x128xf32>
    %cst_30 = arith.constant 5.000000e-01 : f32
    %76 = vector.broadcast %cst_30 : f32 to vector<4x8x128xf32>
    %77 = arith.mulf %76, %72 : vector<4x8x128xf32>
    %78 = arith.mulf %77, %72 : vector<4x8x128xf32>
    %cst_31 = arith.constant 5.000000e-01 : f32
    %79 = vector.broadcast %cst_31 : f32 to vector<4x8x128xf32>
    %80 = arith.subf %73, %79 : vector<4x8x128xf32>
    %81 = arith.select %75, %78, %80 : vector<4x8x128xi1>, vector<4x8x128xf32>
    %cst_32 = arith.constant dense<0.000000e+00> : vector<4x8xf32>
    %82 = vector.multi_reduction <add>, %81, %cst_32 [2] : vector<4x8x128xf32> to vector<4x8xf32>
    %cst_33 = arith.constant dense<0.000000e+00> : vector<4xf32>
    %83 = vector.multi_reduction <add>, %82, %cst_33 [1] : vector<4x8xf32> to vector<4xf32>
    %84 = vector.shape_cast %83 : vector<4xf32> to vector<4x1xf32>
    %cst_34 = arith.constant dense<0.000000e+00> : vector<4x8xf32>
    %85 = vector.multi_reduction <add>, %72, %cst_34 [2] : vector<4x8x128xf32> to vector<4x8xf32>
    %cst_35 = arith.constant dense<0.000000e+00> : vector<4xf32>
    %86 = vector.multi_reduction <add>, %85, %cst_35 [1] : vector<4x8xf32> to vector<4xf32>
    %87 = vector.shape_cast %86 : vector<4xf32> to vector<4x1xf32>
    %c0_36 = arith.constant 0 : index
    %c0_37 = arith.constant 0 : index
    %c0_38 = arith.constant 0 : index
    %88 = vector.load %arg5[%c0_36, %c0_37, %c0_38] : memref<4x8x128xf32, #tpu.memory_space<vmem>>, vector<4x8x128xf32>
    %89 = vector.extract_strided_slice %18 {offsets = [0, 3], sizes = [4, 1], strides = [1, 1]} : vector<4x4xf32> to vector<4x1xf32>
    %90 = vector.shape_cast %89 : vector<4x1xf32> to vector<4xf32>
    %91 = vector.shape_cast %90 : vector<4xf32> to vector<4x1x1xf32>
    %92 = vector.broadcast %91 : vector<4x1x1xf32> to vector<4x8x128xf32>
    %93 = arith.subf %88, %92 : vector<4x8x128xf32>
    %cst_39 = arith.constant 0.000000e+00 : f32
    %94 = vector.broadcast %cst_39 : f32 to vector<4x8x128xf32>
    %95 = arith.select %17, %93, %94 : vector<4x8x128xi1>, vector<4x8x128xf32>
    %96 = math.absf %95 : vector<4x8x128xf32>
    %cst_40 = arith.constant 1.000000e+00 : f32
    %97 = vector.broadcast %cst_40 : f32 to vector<4x8x128xf32>
    %98 = arith.cmpf olt, %96, %97 : vector<4x8x128xf32>
    %cst_41 = arith.constant 5.000000e-01 : f32
    %99 = vector.broadcast %cst_41 : f32 to vector<4x8x128xf32>
    %100 = arith.mulf %99, %95 : vector<4x8x128xf32>
    %101 = arith.mulf %100, %95 : vector<4x8x128xf32>
    %cst_42 = arith.constant 5.000000e-01 : f32
    %102 = vector.broadcast %cst_42 : f32 to vector<4x8x128xf32>
    %103 = arith.subf %96, %102 : vector<4x8x128xf32>
    %104 = arith.select %98, %101, %103 : vector<4x8x128xi1>, vector<4x8x128xf32>
    %cst_43 = arith.constant dense<0.000000e+00> : vector<4x8xf32>
    %105 = vector.multi_reduction <add>, %104, %cst_43 [2] : vector<4x8x128xf32> to vector<4x8xf32>
    %cst_44 = arith.constant dense<0.000000e+00> : vector<4xf32>
    %106 = vector.multi_reduction <add>, %105, %cst_44 [1] : vector<4x8xf32> to vector<4xf32>
    %107 = vector.shape_cast %106 : vector<4xf32> to vector<4x1xf32>
    %cst_45 = arith.constant dense<0.000000e+00> : vector<4x8xf32>
    %108 = vector.multi_reduction <add>, %95, %cst_45 [2] : vector<4x8x128xf32> to vector<4x8xf32>
    %cst_46 = arith.constant dense<0.000000e+00> : vector<4xf32>
    %109 = vector.multi_reduction <add>, %108, %cst_46 [1] : vector<4x8xf32> to vector<4xf32>
    %110 = vector.shape_cast %109 : vector<4xf32> to vector<4x1xf32>
    %111 = tpu.concatenate %38, %61, %84, %107 in 1 : vector<4x1xf32>, vector<4x1xf32>, vector<4x1xf32>, vector<4x1xf32> -> vector<4x4xf32>
    %112 = tpu.concatenate %41, %64, %87, %110 in 1 : vector<4x1xf32>, vector<4x1xf32>, vector<4x1xf32>, vector<4x1xf32> -> vector<4x4xf32>
    %113 = vector.shape_cast %111 : vector<4x4xf32> to vector<1x4x4xf32>
    %114 = vector.shape_cast %112 : vector<4x4xf32> to vector<1x4x4xf32>
    %115 = tpu.concatenate %113, %114 in 0 : vector<1x4x4xf32>, vector<1x4x4xf32> -> vector<2x4x4xf32>
    %116 = vector.shape_cast %115 : vector<2x4x4xf32> to vector<1x2x4x4xf32>
    %c0_47 = arith.constant 0 : index
    %c0_48 = arith.constant 0 : index
    %c0_49 = arith.constant 0 : index
    %c0_50 = arith.constant 0 : index
    %117 = vector.load %arg8[%c0_47, %c0_48, %c0_49, %c0_50] : memref<1x2x4x4xf32, #tpu.memory_space<vmem>>, vector<1x2x4x4xf32>
    %118 = arith.addf %117, %116 : vector<1x2x4x4xf32>
    %c0_51 = arith.constant 0 : index
    %c0_52 = arith.constant 0 : index
    %c0_53 = arith.constant 0 : index
    %c0_54 = arith.constant 0 : index
    %119 = vector.load %arg8[%c0_51, %c0_52, %c0_53, %c0_54] : memref<1x2x4x4xf32, #tpu.memory_space<vmem>>, vector<1x2x4x4xf32>
    tpu.vector_store %arg8[%c0_51, %c0_52, %c0_53, %c0_54], %118 {strides = array<i32>} : memref<1x2x4x4xf32, #tpu.memory_space<vmem>>, vector<1x2x4x4xf32>,
    return
  }
  func.func @transform_0(%arg0: i32, %arg1: i32) -> (i32, i32, i32) {
    %c1_i32 = arith.constant 1 : i32
    %0 = arith.muli %arg0, %c1_i32 : i32
    %1 = arith.addi %0, %arg1 : i32
    %c0_i32 = arith.constant 0 : i32
    %c0_i32_0 = arith.constant 0 : i32
    %c0_i32_1 = arith.constant 0 : i32
    return %c0_i32, %1, %c0_i32_0 : i32, i32, i32
  }
  func.func @transform_1(%arg0: i32, %arg1: i32) -> (i32, i32, i32) {
    %c1_i32 = arith.constant 1 : i32
    %0 = arith.muli %arg0, %c1_i32 : i32
    %1 = arith.addi %0, %arg1 : i32
    %c0_i32 = arith.constant 0 : i32
    %c0_i32_0 = arith.constant 0 : i32
    %c0_i32_1 = arith.constant 0 : i32
    return %c0_i32, %1, %c0_i32_0 : i32, i32, i32
  }
  func.func @transform_2(%arg0: i32, %arg1: i32) -> (i32, i32, i32) {
    %c1_i32 = arith.constant 1 : i32
    %0 = arith.muli %arg0, %c1_i32 : i32
    %1 = arith.addi %0, %arg1 : i32
    %c0_i32 = arith.constant 0 : i32
    %c0_i32_0 = arith.constant 0 : i32
    %c0_i32_1 = arith.constant 0 : i32
    return %c0_i32, %1, %c0_i32_0 : i32, i32, i32
  }
  func.func @transform_3(%arg0: i32, %arg1: i32) -> (i32, i32, i32) {
    %c1_i32 = arith.constant 1 : i32
    %0 = arith.muli %arg0, %c1_i32 : i32
    %1 = arith.addi %0, %arg1 : i32
    %c0_i32 = arith.constant 0 : i32
    %c0_i32_0 = arith.constant 0 : i32
    %c0_i32_1 = arith.constant 0 : i32
    return %c0_i32, %1, %c0_i32_0 : i32, i32, i32
  }
  func.func @transform_4(%arg0: i32, %arg1: i32) -> (i32, i32) {
    %c0_i32 = arith.constant 0 : i32
    %c0_i32_0 = arith.constant 0 : i32
    %c0_i32_1 = arith.constant 0 : i32
    return %c0_i32, %c0_i32_0 : i32, i32
  }
  func.func @transform_5(%arg0: i32, %arg1: i32) -> (i32, i32) {
    %c0_i32 = arith.constant 0 : i32
    %c0_i32_0 = arith.constant 0 : i32
    %c0_i32_1 = arith.constant 0 : i32
    return %c0_i32, %c0_i32_0 : i32, i32
  }
  func.func @transform_6(%arg0: i32, %arg1: i32) -> (i32, i32, i32, i32) {
    %c0_i32 = arith.constant 0 : i32
    %c0_i32_0 = arith.constant 0 : i32
    %c0_i32_1 = arith.constant 0 : i32
    %c0_i32_2 = arith.constant 0 : i32
    return %arg0, %c0_i32, %c0_i32_0, %c0_i32_1 : i32, i32, i32, i32
  }
}

</mosaic_0001>

<bundles_post_ra>
// kernel: tpu_custom_call.1
= control target key start
LH: loop header
LB: loop body
LE: loop exit
PB: predicated region body
PF: predicated region fallthrough
CT: control target
= control target key end

     0   :  { %11 = vsyncpa [#allocation3], 0  ;;  %s1292_s0 = inlined_call_operand.hbm [shape: f32[4,8,128], index: 0, kind: input, shape index: {}]   ;;  %s1293_s1 = inlined_call_operand.hbm [shape: f32[4,8,128], index: 1, kind: input, shape index: {}]   ;;  %s1294_s2 = inlined_call_operand.hbm [shape: f32[4,8,128], index: 2, kind: input, shape index: {}]   ;;  %s1295_s3 = inlined_call_operand.hbm [shape: f32[4,8,128], index: 3, kind: input, shape index: {}]   ;;  %s1296_s4 = inlined_call_operand.vmem [shape: s32[4,1], index: 4, kind: input, shape index: {}]   ;;  %s1297_s5 = inlined_call_operand.vmem [shape: f32[4,4], index: 5, kind: input, shape index: {}]   ;;  %s1298_s6 = inlined_call_operand.hbm [shape: f32[1,2,4,4], index: 6, kind: output, shape index: {}]  }
   0x1   :  { %12 = vsyncpa [#allocation6], 0 }
   0x2   :  { %13 = vsyncpa [#allocation9], 0 }
   0x3   :  { %14 = vsyncpa [#allocation4], 0  ;;  %s900_s21 = smov [#allocation5]   ;;  %s901_s23 = smov [#allocation2]  }
   0x4   :  { %s38_s22 = sshll.u32 %s900_s21, 4  ;;  %s23_s24 = sshll.u32 %s901_s23, 4  ;;  %s39_s22 = int_to_ptr.vmem [resolvable:$true] %s38_s22  ;;  %s950_s24 = int_to_ptr.vmem [resolvable:$true] %s23_s24 }
   0x5   :  { %s782_s27 = scalar_lea.hbm %s1293_s1, 512 }
   0x6   :  { %p783_p0 = scmp.ne.s32.totalorder %s1293_s1, %s782_s27  ;;  %p786_p1 = scmp.lt.u32.totalorder %s782_s27, %s1293_s1 }
   0x8   :  { %p788_p2 = pnand %p786_p1, %p783_p0 }
   0xa   :  { %791 = shalt.err (!%p788_p2)
}
   0xb   :  { %s792_s8 = scalar_lea.vmem %s39_s22, 512  ;;  %p797_p4 = scmp.lt.s32.totalorder %s39_s22, %s39_s22 }
   0xc   :  { %p793_p3 = scmp.ne.s32.totalorder %s39_s22, %s792_s8  ;;  %p798_p5 = scmp.lt.s32.totalorder %s792_s8, %s792_s8 }
   0xe   :  { %p799_p6 = por %p798_p5, %p797_p4 }
  0x10   :  { %p800_p7 = pnand %p799_p6, %p793_p3 }
  0x12   :  { %803 = shalt.err (!%p800_p7)
}
  0x13   :  { %s902_s9 = smov 128   ;;  %s903_s10 = smov 8  }
  0x14   :  { %44 = dma.hbm_to_vmem [thread:$0]  %s1293_s1, 512, %s39_s22, [#allocation6], %s902_s9, %s902_s9, %s903_s10  }
  0x15   :  { %s804_s15 = scalar_lea.hbm %s1292_s0, 512 }
  0x16   :  { %p805_p8 = scmp.ne.s32.totalorder %s1292_s0, %s804_s15  ;;  %p808_p9 = scmp.lt.u32.totalorder %s804_s15, %s1292_s0 }
  0x18   :  { %p810_p10 = pnand %p808_p9, %p805_p8 }
  0x1a   :  { %813 = shalt.err (!%p810_p10)
}
  0x1b   :  { %s814_s20 = scalar_lea.vmem %s950_s24, 512  ;;  %p819_p12 = scmp.lt.s32.totalorder %s950_s24, %s950_s24 }
  0x1c   :  { %p815_p11 = scmp.ne.s32.totalorder %s950_s24, %s814_s20  ;;  %p820_p13 = scmp.lt.s32.totalorder %s814_s20, %s814_s20 }
  0x1e   :  { %p821_p0 = por %p820_p13, %p819_p12 }
  0x20   :  { %p822_p1 = pnand %p821_p0, %p815_p11 }
  0x22   :  { %825 = shalt.err (!%p822_p1)
}
  0x23   :  { %29 = dma.hbm_to_vmem [thread:$0]  %s1292_s0, 512, %s950_s24, [#allocation3], %s902_s9, %s902_s9, %s903_s10  }
  0x24   :  { %s904_s22 = smov [#allocation7]   ;;  %s905_s25 = smov [#allocation8]  }
  0x25   :  { %s53_s23 = sshll.u32 %s904_s22, 4  ;;  %s68_s26 = sshll.u32 %s905_s25, 4  ;;  %s54_s23 = int_to_ptr.vmem [resolvable:$true] %s53_s23  ;;  %s987_s26 = int_to_ptr.vmem [resolvable:$true] %s68_s26 }
  0x26   :  { %s826_s29 = scalar_lea.hbm %s1294_s2, 512 }
  0x27   :  { %p827_p2 = scmp.ne.s32.totalorder %s1294_s2, %s826_s29  ;;  %p830_p3 = scmp.lt.u32.totalorder %s826_s29, %s1294_s2 }
  0x29   :  { %p832_p4 = pnand %p830_p3, %p827_p2 }
  0x2b   :  { %835 = shalt.err (!%p832_p4)
}
  0x2c   :  { %s836_s0 = scalar_lea.vmem %s54_s23, 512  ;;  %p841_p6 = scmp.lt.s32.totalorder %s54_s23, %s54_s23 }
  0x2d   :  { %p837_p5 = scmp.ne.s32.totalorder %s54_s23, %s836_s0  ;;  %p842_p7 = scmp.lt.s32.totalorder %s836_s0, %s836_s0 }
  0x2f   :  { %p843_p8 = por %p842_p7, %p841_p6 }
  0x31   :  { %p844_p9 = pnand %p843_p8, %p837_p5 }
  0x33   :  { %847 = shalt.err (!%p844_p9)
}
  0x34   :  { %59 = dma.hbm_to_vmem [thread:$0]  %s1294_s2, 512, %s54_s23, [#allocation6], %s902_s9, %s902_s9, %s903_s10  }
  0x35   :  { %s848_s15 = scalar_lea.hbm %s1295_s3, 512 }
  0x36   :  { %p849_p10 = scmp.ne.s32.totalorder %s1295_s3, %s848_s15  ;;  %p852_p11 = scmp.lt.u32.totalorder %s848_s15, %s1295_s3 }
  0x38   :  { %p854_p12 = pnand %p852_p11, %p849_p10 }
  0x3a   :  { %857 = shalt.err (!%p854_p12)
}
  0x3b   :  { %s858_s20 = scalar_lea.vmem %s987_s26, 512  ;;  %p863_p0 = scmp.lt.s32.totalorder %s987_s26, %s987_s26 }
  0x3c   :  { %p859_p13 = scmp.ne.s32.totalorder %s987_s26, %s858_s20  ;;  %p864_p1 = scmp.lt.s32.totalorder %s858_s20, %s858_s20 }
  0x3e   :  { %p865_p2 = por %p864_p1, %p863_p0 }
  0x40   :  { %p866_p3 = pnand %p865_p2, %p859_p13 }
  0x42   :  { %869 = shalt.err (!%p866_p3)
}
  0x43   :  { %74 = dma.hbm_to_vmem [thread:$0]  %s1295_s3, 512, %s987_s26, [#allocation9], %s902_s9, %s902_s9, %s903_s10  }
  0x44   :  { %892 = dma.done.wait [#allocation3], 512  }
  0x45   :  { %893 = vsyncadd [#allocation3], 4294966784 }
  0x46   :  { %894 = dma.done.wait [#allocation6], 1024  }
  0x47   :  { %895 = vsyncadd [#allocation6], 4294966272 }
  0x48   :  { %896 = dma.done.wait [#allocation9], 512  }
  0x49   :  { %897 = vsyncadd [#allocation9], 4294966784  ;;  %v104_v0 = vlaneseq  ;;  %v906_v1 = vmov 1   ;;  %v907_v2 = vmov 0   ;;  %v908_v3 = vmov 1966171168  }
  0x4a   :  { %772 = vset.pattern.permute.xlu1 %v906_v1  ;;  %771 = vset.pattern.permute.xlu0 %v907_v2  ;;  %v122_v4 = vunpack.c.l.s4 %v908_v3  ;;  %v739_v9 = vld.sshfl [vmem:[%s1297_s5] sm:$0x33 pattern:$0x75316420]  ;;  %v909_v33 = vmov 3   ;;  %v910_v34 = vmov 2  }
  0x4b   :  { %v105_v5 = vshrl.u32 %v104_v0, 7  ;;  %v738_v11 = vld.sshfl [vmem:[%s1296_s4] sm:$0x33 pattern:$0x75316420]  ;;  %v182_v14 = vcombine.high %v739_v9, %v739_v9  ;;  %v110_v19 = vand.u32 127, %v104_v0 }
  0x4c   :  { %v123_v6 = vunpack.c.0.s8 %v122_v4  ;;  %v120_v13 = vcombine.high %v738_v11, %v738_v11  ;;  %v337_v35 = vld [vmem:[#allocation5] sm:$0xff]  ;;  %v171_v44 = vld [vmem:[#allocation2 + $0x8] sm:$0xff]  ;;  %v172_v53 = vld [vmem:[#allocation2 + $0x10] sm:$0xff]  ;;  %s912_s4 = smov [#allocation10]  }
  0x4d   :  { %v139_v8 = vsub.s32 0, %v105_v5  ;;  %v106_v16 = vmul.u32 128, %v105_v5  ;;  %v1032_v24 = vsub.s32 %v110_v19, %v105_v5  ;;  %v170_v39 = vld [vmem:[#allocation2] sm:$0xff]  ;;  %v338_v52 = vld [vmem:[#allocation5 + $0x8] sm:$0xff]  ;;  %v339_v59 = vld [vmem:[#allocation5 + $0x10] sm:$0xff]  ;;  %s724_s5 = sshll.u32 %s912_s4, 4  ;;  %s725_s5 = int_to_ptr.vmem [resolvable:$true] %s724_s5 }
  0x4e   :  { %v126_v7 = vsub.s32 %v123_v6, %v105_v5  ;;  %v459_v63 = vld [vmem:[#allocation7] sm:$0xff]  ;;  %v460_v3 = vld [vmem:[#allocation7 + $0x8] sm:$0xff]  ;;  %s870_s10 = scalar_lea.vmem %s725_s5, 128  ;;  %p875_p5 = scmp.lt.s32.totalorder %s725_s5, %s725_s5 }
  0x4f   :  { %v1030_v23 = vadd.s32 %v110_v19, %v106_v16  ;;  %v581_v16 = vld [vmem:[#allocation8] sm:$0xff]  ;;  %p871_p4 = scmp.ne.s32.totalorder %s725_s5, %s870_s10  ;;  %p876_p6 = scmp.lt.s32.totalorder %s870_s10, %s870_s10 }
  0x50   :  { %v189_v10 = vrot.slane %v739_v9, %v126_v7  ;;  %v127_v12 = vrot.slane %v738_v11, %v126_v7  ;;  %v134_v21 = vrot.slane %v120_v13, %v126_v7  ;;  %v196_v22 = vrot.slane %v182_v14, %v126_v7  ;;  %v461_v9 = vld [vmem:[#allocation7 + $0x10] sm:$0xff] }
  0x51   :  { %p877_p7 = por %p876_p6, %p875_p5 }
  0x52   :  { %v202_v15 = vrot.slane %v189_v10, %v139_v8  ;;  %v140_v17 = vrot.slane %v127_v12, %v139_v8  ;;  %v135_v18 = vcombine.high %v127_v12, %v127_v12  ;;  %v197_v25 = vcombine.high %v189_v10, %v189_v10  ;;  %v173_v10 = vld [vmem:[#allocation2 + $0x18] sm:$0xff] }
  0x53   :  { %v144_v26 = vrot.slane %v134_v21, %v139_v8  ;;  %v206_v27 = vrot.slane %v196_v22, %v139_v8  ;;  %v136_v28 = vcombine.high %v134_v21, %v134_v21  ;;  %v198_v31 = vcombine.high %v196_v22, %v196_v22  ;;  %p878_p8 = pnand %p877_p7, %p871_p4 }
  0x54   :  { %342 = vperm.xlu1 %772, %v202_v15   ;;  %154 = vperm.xlu0 %771, %v140_v17   ;;  %v148_v20 = vrot.slane %v135_v18, %v139_v8  ;;  %v210_v29 = vrot.slane %v197_v25, %v139_v8  ;;  %v340_v18 = vld [vmem:[#allocation5 + $0x18] sm:$0xff] }
  0x55   :  { %v152_v30 = vrot.slane %v136_v28, %v139_v8  ;;  %v214_v32 = vrot.slane %v198_v31, %v139_v8 }
  0x58   :  { %773 = vset.pattern.permute.xlu1 %v907_v2  ;;  %216 = vperm.xlu0 %771, %v202_v15  }
  0x59   :  { %160 = vperm.xlu1 %773, %v148_v20  }
  0x5c   :  { %157 = vperm.xlu0 %771, %v144_v26  }
  0x5d   :  { %220 = vperm.xlu1 %773, %v206_v27  }
  0x60   :  { %224 = vperm.xlu0 %771, %v210_v29  }
  0x61   :  { %163 = vperm.xlu1 %773, %v152_v30  }
  0x64   :  { %779 = vset.pattern.permute.xlu0 %v909_v33 }
  0x65   :  { %228 = vperm.xlu1 %773, %v214_v32   ;;  %590 = vperm.xlu0 %779, %v206_v27  }
  0x69   :  { %774 = vset.pattern.permute.xlu1 %v906_v1 }
  0x6a   :  { %346 = vperm.xlu1 %774, %v206_v27  }
  0x6e   :  { %350 = vperm.xlu1 %774, %v210_v29  }
  0x72   :  { %775 = vset.pattern.permute.xlu1 %v910_v34 }
  0x73   :  { %464 = vperm.xlu1 %775, %v202_v15  }
  0x77   :  { %468 = vperm.xlu1 %775, %v206_v27  }
  0x7b   :  { %776 = vset.pattern.permute.xlu1 %v906_v1 }
  0x7c   :  { %354 = vperm.xlu1 %776, %v214_v32  }
  0x80   :  { %777 = vset.pattern.permute.xlu1 %v910_v34 }
  0x81   :  { %472 = vperm.xlu1 %777, %v210_v29  }
  0x85   :  { %778 = vset.pattern.permute.xlu1 %v909_v33 }
  0x86   :  { %586 = vperm.xlu1 %778, %v202_v15  }
  0x8a   :  { %780 = vset.pattern.permute.xlu1 %v910_v34 }
  0x8b   :  { %476 = vperm.xlu1 %780, %v214_v32  }
  0x8f   :  { %781 = vset.pattern.permute.xlu1 %v909_v33 }
  0x90   :  { %594 = vperm.xlu1 %781, %v210_v29  }
  0x94   :  { %598 = vperm.xlu1 %781, %v214_v32  }
  0xd3   :  { %v343_v36 = vpop.permute.xlu1 %342  ;;  %v1034_v38 = vpop.permute.xlu0 %154 }
  0xd4   :  { %v357_v37 = vsub.f32 %v337_v35, %v343_v36  ;;  %vm165_vm0 = vcmp.lt.s32.totalorder %v1030_v23, %v1034_v38 }
  0xd6   :  { %v1041_v40 = vsel %vm165_vm0, %v357_v37, 0.0 }
  0xd7   :  { %424 = vadd.xlane.f32.xlu1 %v1041_v40  ;;  %v217_v41 = vpop.permute.xlu0 %216  ;;  %v365_v21 = vand.u32 2147483647, %v1041_v40  ;;  %v373_v22 = vmul.f32 0.5, %v1041_v40 }
  0xd8   :  { %v1044_v42 = vpop.permute.xlu1 %160  ;;  %v231_v43 = vsub.f32 %v170_v39, %v217_v41 }
  0xd9   :  { %vm167_vm2 = vcmp.lt.s32.totalorder %v1030_v23, %v1044_v42  ;;  %v377_v33 = vmul.f32 %v373_v22, %v1041_v40  ;;  %v744_v34 = vadd.f32 -0.5, %v365_v21  ;;  %vm1117_vm5 = vcmp.lt.f32.partialorder %v365_v21, 1.0 }
  0xda   :  { %v235_v45 = vsel %vm165_vm0, %v231_v43, 0.0 }
  0xdb   :  { %v1049_v46 = vpop.permute.xlu0 %157  ;;  %302 = vadd.xlane.f32.xlu0 %v235_v45  ;;  %v247_v13 = vmul.f32 0.5, %v235_v45  ;;  %v239_v17 = vand.u32 2147483647, %v235_v45  ;;  %v385_v40 = vsel %vm1117_vm5, %v377_v33, %v744_v34  ;;  %vm293_vm5 = vcmask 1042434  }
  0xdc   :  { %v221_v47 = vpop.permute.xlu1 %220  ;;  %vm166_vm1 = vcmp.lt.s32.totalorder %v1030_v23, %v1049_v46 }
  0xdd   :  { %v232_v48 = vsub.f32 %v171_v44, %v221_v47  ;;  %v251_v27 = vmul.f32 %v247_v13, %v235_v45  ;;  %v740_v28 = vadd.f32 -0.5, %v239_v17  ;;  %vm243_vm4 = vcmp.lt.f32.partialorder %v239_v17, 1.0  ;;  %v462_v13 = vld [vmem:[#allocation7 + $0x18] sm:$0xff] }
  0xdf   :  { %v1056_v49 = vsel %vm166_vm1, %v232_v48, 0.0  ;;  %v225_v54 = vpop.permute.xlu0 %224  ;;  %v259_v37 = vsel %vm243_vm4, %v251_v27, %v740_v28  ;;  %v582_v48 = vld [vmem:[#allocation8 + $0x8] sm:$0xff] }
  0xe0   :  { %304 = vadd.xlane.f32.xlu1 %v1056_v49  ;;  %v1059_v50 = vpop.permute.xlu1 %163  ;;  %v233_v57 = vsub.f32 %v172_v53, %v225_v54  ;;  %v248_v32 = vmul.f32 0.5, %v1056_v49  ;;  %v240_v35 = vand.u32 2147483647, %v1056_v49 }
  0xe1   :  { %vm168_vm3 = vcmp.lt.s32.totalorder %v1030_v23, %v1059_v50 }
  0xe2   :  { %v1072_v61 = vsel %vm167_vm2, %v233_v57, 0.0  ;;  %v252_v45 = vmul.f32 %v248_v32, %v1056_v49  ;;  %v741_v47 = vadd.f32 -0.5, %v240_v35  ;;  %vm1127_vm7 = vcmp.lt.f32.partialorder %v240_v35, 1.0 }
  0xe4   :  { %v229_v51 = vpop.permute.xlu1 %228 }
  0xe5   :  { %v234_v14 = vsub.f32 %v173_v10, %v229_v51  ;;  %v591_v51 = vpop.permute.xlu0 %590 }
  0xe7   :  { %v1103_v25 = vsel %vm168_vm3, %v234_v14, 0.0 }
  0xe8   :  { %v242_v22 = vand.u32 2147483647, %v1103_v25 }
  0xe9   :  { %v347_v55 = vpop.permute.xlu1 %346 }
  0xea   :  { %v358_v56 = vsub.f32 %v338_v52, %v347_v55  ;;  %v743_v38 = vadd.f32 -0.5, %v242_v22  ;;  %vm246_vm14 = vcmp.lt.f32.partialorder %v242_v22, 1.0 }
  0xec   :  { %v1064_v58 = vsel %vm166_vm1, %v358_v56, 0.0 }
  0xed   :  { %426 = vadd.xlane.f32.xlu1 %v1064_v58  ;;  %v351_v60 = vpop.permute.xlu1 %350  ;;  %v374_v52 = vmul.f32 0.5, %v1064_v58  ;;  %v366_v55 = vand.u32 2147483647, %v1064_v58 }
  0xee   :  { %v359_v62 = vsub.f32 %v339_v59, %v351_v60 }
  0xef   :  { %vm1141_vm9 = vcmp.lt.f32.partialorder %v366_v55, 1.0 }
  0xf0   :  { %v1078_v2 = vsel %vm167_vm2, %v359_v62, 0.0  ;;  %v241_v62 = vand.u32 2147483647, %v1072_v61 }
  0xf1   :  { %306 = vadd.xlane.f32.xlu1 %v1072_v61  ;;  %v375_v53 = vmul.f32 0.5, %v1078_v2  ;;  %v367_v60 = vand.u32 2147483647, %v1078_v2 }
  0xf2   :  { %v465_v0 = vpop.permute.xlu1 %464  ;;  %vm1155_vm11 = vcmp.lt.f32.partialorder %v241_v62, 1.0 }
  0xf3   :  { %v479_v1 = vsub.f32 %v459_v63, %v465_v0  ;;  %v249_v63 = vmul.f32 0.5, %v1072_v61  ;;  %v602_v0 = vsub.f32 %v582_v48, %v591_v51  ;;  %vm1151_vm10 = vcmp.lt.f32.partialorder %v367_v60, 1.0 }
  0xf5   :  { %v483_v4 = vsel %vm165_vm0, %v479_v1, 0.0  ;;  %428 = vadd.xlane.f32.xlu1 %v1078_v2  ;;  %v253_v17 = vmul.f32 %v249_v63, %v1072_v61 }
  0xf6   :  { %546 = vadd.xlane.f32.xlu0 %v483_v4  ;;  %v469_v5 = vpop.permute.xlu1 %468  ;;  %v495_v29 = vmul.f32 0.5, %v483_v4  ;;  %v487_v31 = vand.u32 2147483647, %v483_v4 }
  0xf7   :  { %v480_v6 = vsub.f32 %v460_v3, %v469_v5  ;;  %v260_v3 = vsel %vm1127_vm7, %v252_v45, %v741_v47  ;;  %v378_v5 = vmul.f32 %v374_v52, %v1064_v58  ;;  %vm298_vm7 = vcmask 60416  }
  0xf8   :  { %v499_v41 = vmul.f32 %v495_v29, %v483_v4  ;;  %v748_v43 = vadd.f32 -0.5, %v487_v31  ;;  %vm491_vm6 = vcmp.lt.f32.partialorder %v487_v31, 1.0  ;;  %v583_v31 = vld [vmem:[#allocation8 + $0x10] sm:$0xff] }
  0xf9   :  { %v1087_v7 = vsel %vm166_vm1, %v480_v6, 0.0  ;;  %v745_v6 = vadd.f32 -0.5, %v366_v55 }
  0xfa   :  { %548 = vadd.xlane.f32.xlu1 %v1087_v7  ;;  %v507_v56 = vsel %vm491_vm6, %v499_v41, %v748_v43  ;;  %v488_v21 = vand.u32 2147483647, %v1087_v7  ;;  %vm295_vm6 = vcmask 1043459  }
  0xfb   :  { %v355_v8 = vpop.permute.xlu1 %354 }
  0xfc   :  { %v360_v26 = vsub.f32 %v340_v18, %v355_v8  ;;  %v379_v8 = vmul.f32 %v375_v53, %v1078_v2  ;;  %v606_v2 = vsel %vm166_vm1, %v602_v0, 0.0  ;;  %v742_v18 = vadd.f32 -0.5, %v241_v62 }
  0xfd   :  { %v610_v34 = vand.u32 2147483647, %v606_v2  ;;  %vm1179_vm13 = vcmp.lt.f32.partialorder %v488_v21, 1.0 }
  0xfe   :  { %v1115_v36 = vsel %vm168_vm3, %v360_v26, 0.0  ;;  %v261_v32 = vsel %vm1155_vm11, %v253_v17, %v742_v18  ;;  %vm707_vm11 = vcmask 23552  }
  0xff   :  { %v753_v51 = vadd.f32 -0.5, %v610_v34  ;;  %vm614_vm15 = vcmp.lt.f32.partialorder %v610_v34, 1.0 }
 0x100   :  { %v473_v11 = vpop.permute.xlu1 %472 }
 0x101   :  { %v481_v12 = vsub.f32 %v461_v9, %v473_v11  ;;  %v746_v11 = vadd.f32 -0.5, %v367_v60 }
 0x103   :  { %v1093_v15 = vsel %vm167_vm2, %v481_v12, 0.0  ;;  %v387_v46 = vsel %vm1151_vm10, %v379_v8, %v746_v11  ;;  %vm703_vm10 = vcmask 7168  }
 0x104   :  { %550 = vadd.xlane.f32.xlu1 %v1093_v15  ;;  %v497_v9 = vmul.f32 0.5, %v1093_v15  ;;  %v489_v12 = vand.u32 2147483647, %v1093_v15 }
 0x105   :  { %v587_v19 = vpop.permute.xlu1 %586 }
 0x106   :  { %v601_v20 = vsub.f32 %v581_v16, %v587_v19  ;;  %v250_v16 = vmul.f32 0.5, %v1103_v25  ;;  %v496_v19 = vmul.f32 0.5, %v1087_v7  ;;  %v501_v28 = vmul.f32 %v497_v9, %v1093_v15 }
 0x107   :  { %v750_v29 = vadd.f32 -0.5, %v489_v12  ;;  %vm1172_vm12 = vcmp.lt.f32.partialorder %v489_v12, 1.0 }
 0x108   :  { %v605_v30 = vsel %vm165_vm0, %v601_v20, 0.0  ;;  %308 = vadd.xlane.f32.xlu1 %v1103_v25  ;;  %v386_v20 = vsel %vm1141_vm9, %v378_v5, %v745_v6  ;;  %v254_v33 = vmul.f32 %v250_v16, %v1103_v25  ;;  %v500_v15 = vmul.f32 %v496_v19, %v1087_v7 }
 0x109   :  { %668 = vadd.xlane.f32.xlu0 %v605_v30  ;;  %v617_v39 = vmul.f32 0.5, %v605_v30  ;;  %v609_v44 = vand.u32 2147483647, %v605_v30  ;;  %v509_v43 = vsel %vm1172_vm12, %v501_v28, %v750_v29  ;;  %v368_v25 = vand.u32 2147483647, %v1115_v36 }
 0x10a   :  { %v477_v1 = vpop.permute.xlu1 %476  ;;  %v262_v53 = vsel %vm246_vm14, %v254_v33, %v743_v38  ;;  %vm705_vm9 = vcmask 15360  }
 0x10b   :  { %v621_v57 = vmul.f32 %v617_v39, %v605_v30  ;;  %v752_v59 = vadd.f32 -0.5, %v609_v44  ;;  %vm1133_vm8 = vcmp.lt.f32.partialorder %v609_v44, 1.0  ;;  %v482_v26 = vsub.f32 %v462_v13, %v477_v1 }
 0x10c   :  { %430 = vadd.xlane.f32.xlu1 %v1115_v36  ;;  %v618_v30 = vmul.f32 0.5, %v606_v2  ;;  %v376_v39 = vmul.f32 0.5, %v1115_v36  ;;  %v747_v55 = vadd.f32 -0.5, %v368_v25  ;;  %vm372_vm0 = vcmp.lt.f32.partialorder %v368_v25, 1.0 }
 0x10d   :  { %263 = vadd.xlane.f32.xlu0 %v259_v37  ;;  %v629_v10 = vsel %vm1133_vm8, %v621_v57, %v752_v59  ;;  %v749_v37 = vadd.f32 -0.5, %v488_v21  ;;  %v486_v41 = vsel %vm168_vm3, %v482_v26, 0.0  ;;  %vm99_vm8 = vcmask 27648  }
 0x10e   :  { %v622_v7 = vmul.f32 %v618_v30, %v606_v2  ;;  %v498_v47 = vmul.f32 0.5, %v486_v41  ;;  %v490_v52 = vand.u32 2147483647, %v486_v41  ;;  %v380_v54 = vmul.f32 %v376_v39, %v1115_v36 }
 0x10f   :  { %v595_v27 = vpop.permute.xlu1 %594  ;;  %v508_v48 = vsel %vm1179_vm13, %v500_v15, %v749_v37 }
 0x110   :  { %389 = vadd.xlane.f32.xlu1 %v385_v40  ;;  %v603_v44 = vsub.f32 %v583_v31, %v595_v27  ;;  %v584_v40 = vld [vmem:[#allocation8 + $0x18] sm:$0xff]  ;;  %v630_v59 = vsel %vm614_vm15, %v622_v7, %v753_v51  ;;  %v502_v60 = vmul.f32 %v498_v47, %v486_v41  ;;  %v751_v49 = vadd.f32 -0.5, %v490_v52 }
 0x111   :  { %511 = vadd.xlane.f32.xlu0 %v507_v56  ;;  %v388_v63 = vsel %vm372_vm0, %v380_v54, %v747_v55  ;;  %vm494_vm1 = vcmp.lt.f32.partialorder %v490_v52, 1.0 }
 0x112   :  { %v607_v56 = vsel %vm167_vm2, %v603_v44, 0.0  ;;  %v510_v1 = vsel %vm494_vm1, %v502_v60, %v751_v49 }
 0x113   :  { %v599_v45 = vpop.permute.xlu1 %598  ;;  %v619_v62 = vmul.f32 0.5, %v607_v56  ;;  %v611_v0 = vand.u32 2147483647, %v607_v56 }
 0x114   :  { %265 = vadd.xlane.f32.xlu1 %v260_v3  ;;  %v604_v57 = vsub.f32 %v584_v40, %v599_v45 }
 0x115   :  { %633 = vadd.xlane.f32.xlu0 %v629_v10  ;;  %v623_v42 = vmul.f32 %v619_v62, %v607_v56  ;;  %v754_v4 = vadd.f32 -0.5, %v611_v0  ;;  %vm615_vm2 = vcmp.lt.f32.partialorder %v611_v0, 1.0 }
 0x116   :  { %v608_v36 = vsel %vm168_vm3, %v604_v57, 0.0  ;;  %vm291_vm3 = vcmask 1041409  }
 0x117   :  { %v620_v3 = vmul.f32 0.5, %v608_v36  ;;  %v612_v5 = vand.u32 2147483647, %v608_v36  ;;  %v631_v6 = vsel %vm615_vm2, %v623_v42, %v754_v4 }
 0x118   :  { %391 = vadd.xlane.f32.xlu1 %v386_v20 }
 0x119   :  { %393 = vadd.xlane.f32.xlu0 %v387_v46  ;;  %v624_v8 = vmul.f32 %v620_v3, %v608_v36  ;;  %v755_v9 = vadd.f32 -0.5, %v612_v5  ;;  %vm616_vm4 = vcmp.lt.f32.partialorder %v612_v5, 1.0 }
 0x11b   :  { %v632_v10 = vsel %vm616_vm4, %v624_v8, %v755_v9 }
 0x11c   :  { %267 = vadd.xlane.f32.xlu1 %v261_v32 }
 0x11d   :  { %515 = vadd.xlane.f32.xlu0 %v509_v43 }
 0x120   :  { %513 = vadd.xlane.f32.xlu1 %v508_v48 }
 0x121   :  { %269 = vadd.xlane.f32.xlu0 %v262_v53 }
 0x124   :  { %635 = vadd.xlane.f32.xlu1 %v630_v59 }
 0x125   :  { %395 = vadd.xlane.f32.xlu0 %v388_v63 }
 0x128   :  { %670 = vadd.xlane.f32.xlu1 %v606_v2 }
 0x129   :  { %517 = vadd.xlane.f32.xlu0 %v510_v1 }
 0x12c   :  { %552 = vadd.xlane.f32.xlu1 %v486_v41 }
 0x12d   :  { %637 = vadd.xlane.f32.xlu0 %v631_v6 }
 0x130   :  { %672 = vadd.xlane.f32.xlu1 %v607_v56 }
 0x131   :  { %639 = vadd.xlane.f32.xlu0 %v632_v10 }
 0x134   :  { %674 = vadd.xlane.f32.xlu1 %v608_v36 }
 0x164   :  { %v425_v23 = vpop.xlane.xlu1 %424 }
 0x165   :  { %v439_v29 = vrot.slane %v425_v23, %v1032_v24 }
 0x168   :  { %v303_v58 = vpop.xlane.xlu0 %302 }
 0x169   :  { %v317_v16 = vrot.slane %v303_v58, %v1032_v24 }
 0x16d   :  { %v305_v50 = vpop.xlane.xlu1 %304 }
 0x16e   :  { %v321_v17 = vrot.slane %v305_v50, %v1032_v24 }
 0x170   :  { %v330_v21 = vsel %vm291_vm3, %v321_v17, %v317_v16 }
 0x17a   :  { %v427_v11 = vpop.xlane.xlu1 %426 }
 0x17b   :  { %v443_v22 = vrot.slane %v427_v11, %v1032_v24 }
 0x17d   :  { %v452_v32 = vsel %vm291_vm3, %v443_v22, %v439_v29 }
 0x17e   :  { %v307_v12 = vpop.xlane.xlu1 %306 }
 0x17f   :  { %v325_v19 = vrot.slane %v307_v12, %v1032_v24 }
 0x181   :  { %v331_v28 = vsel %vm293_vm5, %v325_v19, %v330_v21 }
 0x182   :  { %v429_v13 = vpop.xlane.xlu1 %428 }
 0x183   :  { %v1206_v18 = vpop.xlane.xlu0 %546  ;;  %v447_v46 = vrot.slane %v429_v13, %v1032_v24 }
 0x184   :  { %v561_v12 = vrot.slane %v1206_v18, %v1032_v24 }
 0x185   :  { %v453_v35 = vsel %vm293_vm5, %v447_v46, %v452_v32 }
 0x187   :  { %v1200_v14 = vpop.xlane.xlu1 %548 }
 0x188   :  { %v565_v8 = vrot.slane %v1200_v14, %v1032_v24 }
 0x18a   :  { %v574_v14 = vsel %vm291_vm3, %v565_v8, %v561_v12 }
 0x191   :  { %v1202_v2 = vpop.xlane.xlu1 %550 }
 0x192   :  { %v569_v50 = vrot.slane %v1202_v2, %v1032_v24 }
 0x194   :  { %v575_v21 = vsel %vm293_vm5, %v569_v50, %v574_v14 }
 0x195   :  { %v309_v20 = vpop.xlane.xlu1 %308 }
 0x196   :  { %v329_v26 = vrot.slane %v309_v20, %v1032_v24  ;;  %v1212_v27 = vpop.xlane.xlu0 %668 }
 0x198   :  { %v332_v61 = vsel %vm295_vm6, %v329_v26, %v331_v28 }
 0x199   :  { %v431_v30 = vpop.xlane.xlu1 %430  ;;  %v334_v31 = vsel %vm298_vm7, %v332_v61, 0.0 }
 0x19a   :  { %v451_v33 = vrot.slane %v431_v30, %v1032_v24  ;;  %v264_v34 = vpop.xlane.xlu0 %263  ;;  %335 = vadd.xlane.f32.xlu1 %v334_v31 }
 0x19b   :  { %v278_v48 = vrot.slane %v264_v34, %v1032_v24 }
 0x19c   :  { %v454_v15 = vsel %vm295_vm6, %v451_v33, %v453_v35  ;;  %v683_v33 = vrot.slane %v1212_v27, %v1032_v24  ;;  %v911_v27 = vmov 0.0  }
 0x19d   :  { %v390_v37 = vpop.xlane.xlu1 %389  ;;  %v456_v38 = vsel %vm298_vm7, %v454_v15, 0.0  ;;  %100 = vst.msk [vmem:[#allocation10] sm:$0xf] %vm99_vm8, %v911_v27  ;;  %101 = vst.msk [vmem:[#allocation10 + $0x4] sm:$0xf] %vm99_vm8, %v911_v27 }
 0x19e   :  { %v512_v39 = vpop.xlane.xlu0 %511  ;;  %457 = vadd.xlane.f32.xlu1 %v456_v38  ;;  %v404_v54 = vrot.slane %v390_v37, %v1032_v24 }
 0x19f   :  { %v526_v1 = vrot.slane %v512_v39, %v1032_v24 }
 0x1a1   :  { %v266_v41 = vpop.xlane.xlu1 %265 }
 0x1a2   :  { %v634_v43 = vpop.xlane.xlu0 %633  ;;  %v282_v7 = vrot.slane %v266_v41, %v1032_v24 }
 0x1a3   :  { %v648_v26 = vrot.slane %v634_v43, %v1032_v24 }
 0x1a4   :  { %v292_v55 = vsel %vm291_vm3, %v282_v7, %v278_v48 }
 0x1a5   :  { %v392_v25 = vpop.xlane.xlu1 %391 }
 0x1a6   :  { %v394_v44 = vpop.xlane.xlu0 %393  ;;  %v408_v51 = vrot.slane %v392_v25, %v1032_v24 }
 0x1a7   :  { %v412_v57 = vrot.slane %v394_v44, %v1032_v24 }
 0x1a8   :  { %v417_v60 = vsel %vm291_vm3, %v408_v51, %v404_v54  ;;  %v712_v51 = vld [vmem:[#allocation10] sm:$0xf] }
 0x1a9   :  { %v268_v40 = vpop.xlane.xlu1 %267  ;;  %v418_v42 = vsel %vm293_vm5, %v412_v57, %v417_v60  ;;  %v713_v57 = vld [vmem:[#allocation10 + $0x4] sm:$0xf] }
 0x1aa   :  { %v516_v45 = vpop.xlane.xlu0 %515  ;;  %v286_v47 = vrot.slane %v268_v40, %v1032_v24 }
 0x1ab   :  { %v534_v9 = vrot.slane %v516_v45, %v1032_v24 }
 0x1ac   :  { %v294_v59 = vsel %vm293_vm5, %v286_v47, %v292_v55 }
 0x1ad   :  { %v514_v52 = vpop.xlane.xlu1 %513 }
 0x1ae   :  { %v270_v53 = vpop.xlane.xlu0 %269  ;;  %v530_v49 = vrot.slane %v514_v52, %v1032_v24 }
 0x1af   :  { %v290_v56 = vrot.slane %v270_v53, %v1032_v24 }
 0x1b0   :  { %v539_v4 = vsel %vm291_vm3, %v530_v49, %v526_v1 }
 0x1b1   :  { %v636_v62 = vpop.xlane.xlu1 %635  ;;  %v296_v63 = vsel %vm295_vm6, %v290_v56, %v294_v59  ;;  %v540_v13 = vsel %vm293_vm5, %v534_v9, %v539_v4 }
 0x1b2   :  { %v396_v0 = vpop.xlane.xlu0 %395  ;;  %v299_v36 = vsel %vm298_vm7, %v296_v63, 0.0  ;;  %v652_v2 = vrot.slane %v636_v62, %v1032_v24 }
 0x1b3   :  { %v416_v3 = vrot.slane %v396_v0, %v1032_v24  ;;  %300 = vadd.xlane.f32.xlu0 %v299_v36 }
 0x1b4   :  { %v661_v30 = vsel %vm291_vm3, %v652_v2, %v648_v26 }
 0x1b5   :  { %v671_v5 = vpop.xlane.xlu1 %670  ;;  %v419_v6 = vsel %vm295_vm6, %v416_v3, %v418_v42 }
 0x1b6   :  { %v518_v10 = vpop.xlane.xlu0 %517  ;;  %v421_v23 = vsel %vm298_vm7, %v419_v6, 0.0  ;;  %v687_v29 = vrot.slane %v671_v5, %v1032_v24 }
 0x1b7   :  { %v538_v11 = vrot.slane %v518_v10, %v1032_v24  ;;  %422 = vadd.xlane.f32.xlu0 %v421_v23 }
 0x1b8   :  { %v696_v37 = vsel %vm291_vm3, %v687_v29, %v683_v33 }
 0x1b9   :  { %v553_v58 = vpop.xlane.xlu1 %552  ;;  %v541_v16 = vsel %vm295_vm6, %v538_v11, %v540_v13 }
 0x1ba   :  { %v573_v17 = vrot.slane %v553_v58, %v1032_v24  ;;  %v638_v19 = vpop.xlane.xlu0 %637  ;;  %v543_v20 = vsel %vm298_vm7, %v541_v16, 0.0 }
 0x1bb   :  { %544 = vadd.xlane.f32.xlu0 %v543_v20  ;;  %v656_v22 = vrot.slane %v638_v19, %v1032_v24 }
 0x1bc   :  { %v576_v18 = vsel %vm295_vm6, %v573_v17, %v575_v21 }
 0x1bd   :  { %v673_v46 = vpop.xlane.xlu1 %672  ;;  %v578_v28 = vsel %vm298_vm7, %v576_v18, 0.0  ;;  %v662_v34 = vsel %vm293_vm5, %v656_v22, %v661_v30 }
 0x1be   :  { %v640_v61 = vpop.xlane.xlu0 %639  ;;  %579 = vadd.xlane.f32.xlu1 %v578_v28  ;;  %v691_v31 = vrot.slane %v673_v46, %v1032_v24 }
 0x1bf   :  { %v660_v32 = vrot.slane %v640_v61, %v1032_v24 }
 0x1c0   :  { %v697_v41 = vsel %vm293_vm5, %v691_v31, %v696_v37 }
 0x1c1   :  { %v675_v35 = vpop.xlane.xlu1 %674  ;;  %v663_v15 = vsel %vm295_vm6, %v660_v32, %v662_v34 }
 0x1c2   :  { %v695_v38 = vrot.slane %v675_v35, %v1032_v24  ;;  %v665_v39 = vsel %vm298_vm7, %v663_v15, 0.0 }
 0x1c3   :  { %666 = vadd.xlane.f32.xlu0 %v665_v39 }
 0x1c4   :  { %v698_v43 = vsel %vm295_vm6, %v695_v38, %v697_v41 }
 0x1c5   :  { %v700_v25 = vsel %vm298_vm7, %v698_v43, 0.0 }
 0x1c6   :  { %701 = vadd.xlane.f32.xlu1 %v700_v25 }
 0x227   :  { %v336_v40 = vpop.xlane.xlu1 %335 }
 0x22b   :  { %v458_v24 = vpop.xlane.xlu1 %457 }
 0x22c   :  { %v709_v55 = vsel %vm703_vm10, %v336_v40, %v458_v24 }
 0x240   :  { %v301_v44 = vpop.xlane.xlu0 %300 }
 0x244   :  { %v423_v45 = vpop.xlane.xlu0 %422 }
 0x245   :  { %v704_v47 = vsel %vm703_vm10, %v301_v44, %v423_v45 }
 0x248   :  { %v545_v7 = vpop.xlane.xlu0 %544 }
 0x249   :  { %v706_v52 = vsel %vm705_vm9, %v704_v47, %v545_v7 }
 0x24b   :  { %v580_v48 = vpop.xlane.xlu1 %579 }
 0x24c   :  { %v710_v59 = vsel %vm705_vm9, %v709_v55, %v580_v48 }
 0x250   :  { %v667_v53 = vpop.xlane.xlu0 %666 }
 0x251   :  { %v708_v54 = vsel %vm707_vm11, %v706_v52, %v667_v53 }
 0x252   :  { %v714_v56 = vadd.f32 %v712_v51, %v708_v54 }
 0x253   :  { %v702_v60 = vpop.xlane.xlu1 %701 }
 0x254   :  { %717 = vst.msk [vmem:[#allocation10] sm:$0xf] %vm99_vm8, %v714_v56  ;;  %v711_v49 = vsel %vm707_vm11, %v710_v59, %v702_v60 }
 0x255   :  { %v715_v62 = vadd.f32 %v713_v57, %v711_v49 }
 0x257   :  { %718 = vst.msk [vmem:[#allocation10 + $0x4] sm:$0xf] %vm99_vm8, %v715_v62 }
 0x258   :  { %881 = shalt.err (!%p878_p8)
}
 0x259   :  { %s882_s26 = scalar_lea.hbm %s1298_s6, 128 }
 0x25a   :  { %p883_p9 = scmp.ne.s32.totalorder %s1298_s6, %s882_s26  ;;  %p886_p10 = scmp.lt.u32.totalorder %s882_s26, %s1298_s6 }
 0x25c   :  { %p888_p11 = pnand %p886_p10, %p883_p9 }
 0x25e   :  { %891 = shalt.err (!%p888_p11)
}
 0x25f   :  { %s913_s7 = smov 64   ;;  %s914_s8 = smov 4  }
 0x260   :  { %730 = dma.vmem_to_hbm [thread:$0]  %s725_s5, 128, %s1298_s6, [#allocation4], %s913_s7, %s913_s7, %s914_s8  }
 0x261   :  { %898 = dma.done.wait [#allocation4], 128  }
 0x262   :  { %899 = vsyncadd [#allocation4], 4294967168 }
 0x263   :  { %734 = vsyncpa [#allocation3], 1 }
 0x264   :  { %735 = vsyncpa [#allocation6], 1 }
 0x265   :  { %736 = vsyncpa [#allocation9], 1 }
 0x266   :  { %737 = vsyncpa [#allocation4], 1 }

</bundles_post_ra>
